<compile_context>
chip_gen: v7x
topology: tpu7x:2x2x1
jax: 0.10.0
libtpu: 0.0.40
codegen_flags: <defaults>
</compile_context>

<pallas_src>
import jax
import jax.numpy as jnp
from jax.experimental import pallas as pl
from jax.experimental.pallas import tpu as pltpu

LEAKY_RATE = 0.1


def _conv_mm_leaky_kernel(x_ref, w_ref, b_ref, o_ref):
    """Single-pass kernel (weight fully resident).

    x_ref: (K, tn)      -- K = C_in*kh*kw taps on sublanes, tn pixels on lanes
    w_ref: (C_out, K)   -- resident (constant index_map)
    b_ref: (C_out, 1)   -- resident bias column (float32)
    o_ref: (C_out, tn)  -- lane-dense output tile, lands directly in NCHW
    """
    acc = jnp.dot(w_ref[...], x_ref[...], preferred_element_type=jnp.float32)
    acc = acc + b_ref[...]                                    # broadcast over lanes
    o_ref[...] = jnp.maximum(acc, LEAKY_RATE * acc).astype(o_ref.dtype)


def _conv_mm_leaky_acc_kernel(x_ref, w_ref, b_ref, o_ref, acc_ref):
    """K-tiled kernel: reduction over grid axis 2 into a float32 VMEM accumulator.

    x_ref: (tk, tn)   w_ref: (C_out, tk)   b_ref: (C_out, 1)
    o_ref: (C_out, tn)   acc_ref: (C_out, tn) float32 scratch
    """
    k = pl.program_id(2)

    @pl.when(k == 0)
    def _():
        acc_ref[...] = jnp.zeros_like(acc_ref)

    acc_ref[...] += jnp.dot(w_ref[...], x_ref[...],
                            preferred_element_type=jnp.float32)

    @pl.when(k == pl.num_programs(2) - 1)
    def _():
        acc = acc_ref[...] + b_ref[...]
        o_ref[...] = jnp.maximum(acc, LEAKY_RATE * acc).astype(o_ref.dtype)


def conv2d_forward(x, weight, bias, *, stride=1, padding=0,
                   tn_max=2048, k_tile=512, k_resident_max=2048):
    """Forward of pointutil.Conv2d (bn=False -> Identity, use_leaky=True).

    x      : [B, C_in, H, W]          (NCHW, like PyTorch)
    weight : [C_out, C_in, kh, kw]    (PyTorch conv weight layout)
    bias   : [C_out]
    returns: [B, C_out, Ho, Wo]
    """
    B, C_in, H, W = x.shape
    C_out, _, kh, kw = weight.shape

    if kh == 1 and kw == 1 and stride == 1 and padding == 0:
        # Fast path: NCHW is already [C_in, H*W] per batch -> free reshape only.
        Ho, Wo = H, W
        K = C_in
        x3d = x.reshape(B, C_in, H * W)
    else:
        # General path: im2col.  conv_general_dilated_patches orders taps as
        # (C_in major, kh, kw minor), matching weight.reshape(C_out, C_in*kh*kw).
        patches = jax.lax.conv_general_dilated_patches(
            x,
            filter_shape=(kh, kw),
            window_strides=(stride, stride),
            padding=[(padding, padding), (padding, padding)],
        )  # [B, C_in*kh*kw, Ho, Wo]
        _, K, Ho, Wo = patches.shape
        x3d = patches.reshape(B, K, Ho * Wo)

    M = Ho * Wo
    itemsize = jnp.dtype(x.dtype).itemsize
    w2d = weight.reshape(C_out, K).astype(x.dtype)   # [C_out, K]
    b2d = bias.reshape(C_out, 1).astype(jnp.float32)  # [C_out, 1]

    # VMEM budget for double-buffered tiles (well under the 32 MiB default
    # scoped limit and v7x's 64 MiB physical VMEM).
    vmem_budget = 8 * 1024 * 1024

    use_k_grid = K > k_resident_max

    if not use_k_grid:
        # ---- resident-weight path -------------------------------------------
        tn_cap = max(128, (vmem_budget // (2 * (K + C_out) * itemsize)) // 128 * 128)
        tn_target = min(tn_max, tn_cap)
        # Full pixel extent (always a legal block) or a 128-multiple tile
        # (partial edge block is write-masked by Pallas -> no explicit pad pass).
        tn = M if M <= tn_target else tn_target
        grid = (B, pl.cdiv(M, tn))

        out3d = pl.pallas_call(
            _conv_mm_leaky_kernel,
            out_shape=jax.ShapeDtypeStruct((B, C_out, M), x.dtype),
            grid_spec=pltpu.PrefetchScalarGridSpec(
                num_scalar_prefetch=0,
                grid=grid,
                in_specs=[
                    # x tile: squeeze batch dim, K on sublanes, tn pixels on lanes
                    pl.BlockSpec((None, K, tn), lambda b, j: (b, 0, j)),
                    # weight / bias: constant index_map -> stays VMEM-resident
                    pl.BlockSpec((C_out, K), lambda b, j: (0, 0)),
                    pl.BlockSpec((C_out, 1), lambda b, j: (0, 0)),
                ],
                out_specs=pl.BlockSpec((None, C_out, tn), lambda b, j: (b, 0, j)),
            ),
            compiler_params=pltpu.CompilerParams(
                dimension_semantics=("parallel", "parallel")),
        )(x3d, w2d, b2d)
    else:
        # ---- K-tiled path (large C_in*kh*kw) ---------------------------------
        tk = max(128, (k_tile // 128) * 128)   # lane dim of weight block -> 128-multiple
        Kp = pl.cdiv(K, tk) * tk
        if Kp != K:
            # Zero-pad the tap axis: zero taps contribute nothing to the dot.
            x3d = jnp.pad(x3d, ((0, 0), (0, Kp - K), (0, 0)))
            w2d = jnp.pad(w2d, ((0, 0), (0, Kp - K)))

        per_lane = 2 * (tk + C_out) * itemsize + 4 * C_out   # x+out double-buf, f32 acc
        tn_cap = max(128, (vmem_budget // per_lane) // 128 * 128)
        tn_target = min(tn_max, tn_cap)
        tn = M if M <= tn_target else tn_target
        grid = (B, pl.cdiv(M, tn), Kp // tk)

        out3d = pl.pallas_call(
            _conv_mm_leaky_acc_kernel,
            out_shape=jax.ShapeDtypeStruct((B, C_out, M), x.dtype),
            grid_spec=pltpu.PrefetchScalarGridSpec(
                num_scalar_prefetch=0,
                grid=grid,
                in_specs=[
                    pl.BlockSpec((None, tk, tn), lambda b, j, k: (b, k, j)),
                    pl.BlockSpec((C_out, tk), lambda b, j, k: (0, k)),
                    pl.BlockSpec((C_out, 1), lambda b, j, k: (0, 0)),
                ],
                # Same output block across k -> stays resident over the reduction.
                out_specs=pl.BlockSpec((None, C_out, tn), lambda b, j, k: (b, 0, j)),
                scratch_shapes=[pltpu.VMEM((C_out, tn), jnp.float32)],
            ),
            compiler_params=pltpu.CompilerParams(
                dimension_semantics=("parallel", "parallel", "arbitrary")),
        )(x3d, w2d, b2d)

    return out3d.reshape(B, C_out, Ho, Wo)

# TODO(synk): BatchNorm2d branch (bn=True) not implemented — module default is bn=False (Identity).


if __name__ == "__main__":
    # Module defaults: kernel_size=1, stride=1, padding=0, bias=True, LeakyReLU(0.1).
    B, C_in, C_out, H, W = 2, 4, 8, 16, 16
    key = jax.random.PRNGKey(0)
    kx, kw_, kb = jax.random.split(key, 3)

    x = jax.random.normal(kx, (B, C_in, H, W), dtype=jnp.float32)
    weight = jax.random.normal(kw_, (C_out, C_in, 1, 1), dtype=jnp.float32) * 0.1
    bias = jax.random.normal(kb, (C_out,), dtype=jnp.float32) * 0.1

    out = conv2d_forward(x, weight, bias, stride=1, padding=0)
    out = jax.block_until_ready(out)

    # Plain-JAX reference (1x1 conv == channel matmul).
    ref = jnp.einsum("bchw,oc->bohw", x, weight[:, :, 0, 0]) + bias[None, :, None, None]
    ref = jnp.where(ref > 0, ref, LEAKY_RATE * ref)
    assert out.shape == (B, C_out, H, W)
    assert jnp.allclose(out, ref, atol=1e-5, rtol=1e-5)

    # General path sanity (kh=kw=3, padding=1) -- verifies im2col tap ordering.
    kw3, kb3 = jax.random.split(kb)
    w3 = jax.random.normal(kw3, (C_out, C_in, 3, 3), dtype=jnp.float32) * 0.1
    b3 = jax.random.normal(kb3, (C_out,), dtype=jnp.float32) * 0.1
    out3 = jax.block_until_ready(conv2d_forward(x, w3, b3, stride=1, padding=1))
    ref3 = jax.lax.conv_general_dilated(
        x, w3, window_strides=(1, 1), padding=[(1, 1), (1, 1)],
        dimension_numbers=("NCHW", "OIHW", "NCHW"),
        precision=jax.lax.Precision.HIGHEST) + b3[None, :, None, None]
    ref3 = jnp.where(ref3 > 0, ref3, LEAKY_RATE * ref3)
    assert out3.shape == ref3.shape
    assert jnp.allclose(out3, ref3, atol=1e-3, rtol=1e-3)

    # K-tiled accumulation path (forced via small k_resident_max / k_tile):
    # C_in=16, 3x3 -> K=144 -> padded to 256 -> 2 K-tiles of 128.
    C_in_big = 16
    kxb, kwb, kbb = jax.random.split(kw3, 3)
    xb = jax.random.normal(kxb, (B, C_in_big, H, W), dtype=jnp.float32)
    wb = jax.random.normal(kwb, (C_out, C_in_big, 3, 3), dtype=jnp.float32) * 0.1
    bb = jax.random.normal(kbb, (C_out,), dtype=jnp.float32) * 0.1
    outb = jax.block_until_ready(
        conv2d_forward(xb, wb, bb, stride=1, padding=1,
                       k_tile=128, k_resident_max=0))
    refb = jax.lax.conv_general_dilated(
        xb, wb, window_strides=(1, 1), padding=[(1, 1), (1, 1)],
        dimension_numbers=("NCHW", "OIHW", "NCHW"),
        precision=jax.lax.Precision.HIGHEST) + bb[None, :, None, None]
    refb = jnp.where(refb > 0, refb, LEAKY_RATE * refb)
    assert outb.shape == refb.shape
    assert jnp.allclose(outb, refb, atol=1e-3, rtol=1e-3)

    print("KERNEL_OK")
</pallas_src>

<mosaic_0001>
module attributes {stable_mosaic.version = 11 : i64} {
  func.func @_conv_mm_leaky_kernel(%arg0: i32, %arg1: i32, %arg2: memref<1x4x256xf32, #tpu.memory_space<vmem>>, %arg3: memref<8x4xf32, #tpu.memory_space<vmem>>, %arg4: memref<8x1xf32, #tpu.memory_space<vmem>>, %arg5: memref<1x8x256xf32, #tpu.memory_space<vmem>>) attributes {dimension_semantics = [#tpu.dimension_semantics<parallel>, #tpu.dimension_semantics<parallel>], iteration_bounds = array<i64: 2, 1>, scalar_prefetch = 0 : i64, scratch_operands = 0 : i64, tpu.core_type = #tpu.core_type<tc>, window_params = [{transform_indices = @transform_0, window_bounds = array<i64: 1, 4, 256>}, {pipeline_mode = #tpu.pipeline_mode<synchronous>, transform_indices = @transform_1, window_bounds = array<i64: 8, 4>}, {pipeline_mode = #tpu.pipeline_mode<synchronous>, transform_indices = @transform_2, window_bounds = array<i64: 8, 1>}, {transform_indices = @transform_3, window_bounds = array<i64: 1, 8, 256>}]} {
    %c0 = arith.constant 0 : index
    %c0_0 = arith.constant 0 : index
    %0 = vector.load %arg3[%c0, %c0_0] : memref<8x4xf32, #tpu.memory_space<vmem>>, vector<8x4xf32>
    %c0_1 = arith.constant 0 : index
    %c0_2 = arith.constant 0 : index
    %c0_3 = arith.constant 0 : index
    %1 = vector.load %arg2[%c0_1, %c0_2, %c0_3] : memref<1x4x256xf32, #tpu.memory_space<vmem>>, vector<1x4x256xf32>
    %2 = vector.shape_cast %1 : vector<1x4x256xf32> to vector<4x256xf32>
    %cst = arith.constant dense<0.000000e+00> : vector<8x256xf32>
    %3 = tpu.matmul %0, %2, %cst {dimension_numbers = #tpu.dot_dimension_numbers<[1], [0], [0], [1], [0, 0, 1, 1], [], []>} : vector<8x4xf32>, vector<4x256xf32>, vector<8x256xf32> -> vector<8x256xf32>
    %c0_4 = arith.constant 0 : index
    %c0_5 = arith.constant 0 : index
    %4 = vector.load %arg4[%c0_4, %c0_5] : memref<8x1xf32, #tpu.memory_space<vmem>>, vector<8x1xf32>
    %5 = vector.broadcast %4 : vector<8x1xf32> to vector<8x256xf32>
    %6 = arith.addf %3, %5 : vector<8x256xf32>
    %cst_6 = arith.constant 1.000000e-01 : f32
    %7 = vector.broadcast %cst_6 : f32 to vector<8x256xf32>
    %8 = arith.mulf %7, %6 : vector<8x256xf32>
    %9 = arith.maximumf %6, %8 : vector<8x256xf32>
    %c0_7 = arith.constant 0 : index
    %c0_8 = arith.constant 0 : index
    %c0_9 = arith.constant 0 : index
    %10 = vector.load %arg5[%c0_7, %c0_8, %c0_9] : memref<1x8x256xf32, #tpu.memory_space<vmem>>, vector<1x8x256xf32>
    %11 = vector.shape_cast %10 : vector<1x8x256xf32> to vector<8x256xf32>
    %12 = vector.shape_cast %9 : vector<8x256xf32> to vector<1x8x256xf32>
    tpu.vector_store %arg5[%c0_7, %c0_8, %c0_9], %12 {strides = array<i32>} : memref<1x8x256xf32, #tpu.memory_space<vmem>>, vector<1x8x256xf32>,
    return
  }
  func.func @transform_0(%arg0: i32, %arg1: i32) -> (i32, i32, i32) {
    %c0_i32 = arith.constant 0 : i32
    %c0_i32_0 = arith.constant 0 : i32
    return %arg0, %c0_i32, %arg1 : i32, i32, i32
  }
  func.func @transform_1(%arg0: i32, %arg1: i32) -> (i32, i32) {
    %c0_i32 = arith.constant 0 : i32
    %c0_i32_0 = arith.constant 0 : i32
    %c0_i32_1 = arith.constant 0 : i32
    return %c0_i32, %c0_i32_0 : i32, i32
  }
  func.func @transform_2(%arg0: i32, %arg1: i32) -> (i32, i32) {
    %c0_i32 = arith.constant 0 : i32
    %c0_i32_0 = arith.constant 0 : i32
    %c0_i32_1 = arith.constant 0 : i32
    return %c0_i32, %c0_i32_0 : i32, i32
  }
  func.func @transform_3(%arg0: i32, %arg1: i32) -> (i32, i32, i32) {
    %c0_i32 = arith.constant 0 : i32
    %c0_i32_0 = arith.constant 0 : i32
    return %arg0, %c0_i32, %arg1 : i32, i32, i32
  }
}

</mosaic_0001>

<bundles_post_ra>
// kernel: tpu_custom_call.1
= control target key start
LH: loop header
LB: loop body
LE: loop exit
PB: predicated region body
PF: predicated region fallthrough
CT: control target
= control target key end

     0   :  { %8 = vsyncpa [#allocation3], 0  ;;  %s687_s0 = inlined_call_operand.vmem [shape: f32[2,4,256], index: 0, kind: input, shape index: {}]   ;;  %s688_s1 = inlined_call_operand.vmem [shape: f32[8,4], index: 1, kind: input, shape index: {}]   ;;  %s689_s2 = inlined_call_operand.vmem [shape: f32[8,1], index: 2, kind: input, shape index: {}]   ;;  %s690_s3 = inlined_call_operand.hbm [shape: f32[2,8,256], index: 3, kind: output, shape index: {}]  }
   0x1   :  { %10 = vsyncpa [#allocation3 + $0x1], 0  ;;  %s569_s12 = smov 0   ;;  %s571_s13 = smov 0  }
   0x2   :  { %s573_s14 = smov 0   ;;  %s575_s15 = smov 0  }
   0x3   :  { %s577_s16 = smov 0   ;;  %s579_s17 = smov 0  }
   0x4 LB: > { %s389_s18 = sadd.s32 4294967295, %s544_s17   ;;  %s390_s19 = sadd.s32 4294967294, %s544_s17   ;;  %s544_s17 = sphi %s579_s17, %s16_s17   ;;  %s540_s16 = sphi %s577_s16, %s697_s16   ;;  %s536_s15 = sphi %s575_s15, %s696_s15   ;;  %s532_s14 = sphi %s573_s14, %s695_s14   ;;  %s528_s13 = sphi %s571_s13, %s694_s13   ;;  %s524_s12 = sphi %s569_s12, %s693_s12  }
   0x5   : > { %s28_s20 = sadd.s32 1, %s540_s16  ;;  %s107_s21 = sadd.s32 1, %s532_s14 }
   0x6   : > { %p30_p0 = scmp.ge.s32.totalorder %s28_s20, 2  ;;  %p117_p1 = scmp.ne.s32.totalorder %s532_s14, %s528_s13 }
   0x7   : > { %p118_p2 = scmp.eq.s32.totalorder %s389_s18, 1  ;;  %p123_p3 = scmp.ne.s32.totalorder %s528_s13, %s524_s12 }
   0x8   : > { %s699_s20 = smov (%p30_p0, %s28_s20), 0  ;;  %p124_p5 = scmp.eq.s32.totalorder %s390_s19, 1 }
   0x9   : > { %p609_p4 = por %p118_p2, %p117_p1  ;;  %s102_s23 = ssub.s32 %s540_s16, %s699_s20 }
   0xa   : > { %p393_p6 = scmp.ge.s32.totalorder %s544_s17, 1  ;;  %p105_p7 = scmp.eq.s32.totalorder %s102_s23, 0 }
   0xb   : > { %p616_p8 = por %p124_p5, %p123_p3  ;;  %p161_p9 = scmp.lt.s32.totalorder %s544_s17, 3 }
   0xc   : > { %s622_s25 = scalar_select %p105_p7, %s532_s14, %s107_s21  }
   0xd   : > { %p162_p10 = pnand %p393_p6, %p161_p9 }
   0xe   : > { %p190_p11 = scmp.lt.s32.totalorder (!%p162_p10), %s536_s15, 1  ;;  %v546_v0 = vmov (!%p162_p10), 0.0   ;;  %v547_v1 = vmov (!%p162_p10), 0   ;;  %v202_v2 = vld [vmem:[%s689_s2] sm:$0xff] (!%p162_p10)  ;;  %vm214_vm0 = vcmask (!%p162_p10), 1043456   ;;  %vm210_vm1 = vcmask (!%p162_p10), 31744  }
   0xf   : > { %165 = sbr.rel (%p162_p10) target bundleno = 264 (0x108), region = 32  ;;  %283 = vmatprep.mubr.f32.mxu0 (!%p162_p10), %v546_v0  ;;  %464 = vset.pattern.permute.xlu0 (!%p162_p10), %v547_v1  ;;  %v200_v5 = vld [vmem:[%s688_s1] sm:$0xff] (!%p162_p10)  ;;  %s186_s8 = sand.u32 (!%p162_p10), 1, %s528_s13  }
  0x10   : > { %205 = vperm.xlu0 (!%p162_p10), %464, %v202_v2   ;;  %s394_s9 = sshll.u32 (!%p162_p10), %s186_s8, 4  ;;  %s406_s10 = sshll.u32 (!%p162_p10), %s536_s15, 8 }
  0x11   : > { %s188_s11 = scalar_lea.vmem (!%p162_p10), [#allocation2], %s394_s9  ;;  %s640_s23 = scalar_lea.hbm (!%p162_p10), %s690_s3, %s406_s10 }
  0x12   : > { %s313_s18 = sshll.u32 (!%p162_p10), %s188_s11, 4  ;;  %s297_s26 = scalar_lea.sflag (!%p162_p10), [#allocation3], %s186_s8  ;;  %s642_s18 = int_to_ptr.vmem [resolvable:$true] %s313_s18 }
  0x13   : > { %s466_s27 = scalar_lea.vmem (!%p162_p10), %s642_s18, 256 }
  0x14   : > { %p467_p12 = scmp.ne.s32.totalorder (!%p162_p10), %s642_s18, %s466_s27 }
  0x16   : > { %s191_s28 = scalar_select %p190_p11, %s536_s15, 1 }
  0x17   : > { %p468_p13 = pnand %p467_p12, %p609_p4  ;;  %s548_s15 = smov [#allocation2]  }
  0x18   : > { %s405_s29 = sshll.u32 %s191_s28, 3  ;;  %s470_s28 = sshll.u32 %s548_s15, 4  ;;  %s471_s28 = int_to_ptr.vmem [resolvable:$false] %s470_s28 }
  0x19   : > { %s197_s5 = scalar_lea.vmem %s687_s0, %s405_s29  ;;  %p469_p0 = pneg %p468_p13 }
  0x1a   : > { %v201_v3 = vld [vmem:[%s197_s5] sm:$0xff]  ;;  %s472_s29 = scalar_lea.vmem %s471_s28, 512  ;;  %p473_p1 = scmp.lt.s32.totalorder %s642_s18, %s471_s28 }
  0x1b   : > { %v209_v4 = vcombine.high %v201_v3, %v201_v3  ;;  %p474_p2 = scmp.lt.s32.totalorder %s472_s29, %s466_s27 }
  0x1d   : > { %397 = vmatprep.subr.msk.mxu0 %vm214_vm0, %v209_v4  ;;  %p475_p3 = por %p474_p2, %p473_p1 }
  0x1e   : > { %398 = vmatpush1.msk.msra.mxu0 %vm214_vm0, %v201_v3 }
  0x1f   : > { %399 = vmatmul.mubr.msk.f32.vlgmr.msra.gmra.mrb[0].mxu0 %vm210_vm1, %v200_v5  ;;  %p476_p5 = pnand %p475_p3, %p469_p0 }
  0x8f   : > { %v206_v6 = vpop.permute.xlu0 %205 }
  0xf2   : > { %v285_v7 = vpop.f32.mrb[0].mxu0 }
  0xf3   : > { %v286_v8 = vadd.f32 %v285_v7, %v206_v6  ;;  %v287_v9 = vpop.f32.mrb[1].mxu0 }
  0xf4   : > { %v288_v10 = vadd.f32 %v287_v9, %v206_v6 }
  0xf5   : > { %v290_v11 = vmul.f32 0.1, %v286_v8 }
  0xf6   : > { %v291_v12 = vmul.f32 0.1, %v288_v10 }
  0xf7   : > { %v292_v13 = vmax.f32 %v286_v8, %v290_v11 }
  0xf8   : > { %v293_v14 = vmax.f32 %v288_v10, %v291_v12 }
  0xf9   : > { %294 = vst [vmem:[%s188_s11] sm:$0xff] %v292_v13 }
  0xfa   : > { %295 = vst [vmem:[%s188_s11 + $0x8] sm:$0xff] %v293_v14 }
  0xfb   : > { %479 = shalt.err (!%p476_p5)
}
  0xfc   : > { %s480_s30 = scalar_lea.hbm %s640_s23, 256  ;;  %s484_s6 = scalar_lea.hbm %s690_s3, 512 }
  0xfd   : > { %p481_p6 = scmp.ne.s32.totalorder %s640_s23, %s480_s30  ;;  %p485_p10 = scmp.lt.u32.totalorder %s640_s23, %s690_s3 }
  0xfe   : > { %p486_p11 = scmp.lt.u32.totalorder %s484_s6, %s480_s30  ;;  %p488_p13 = scmp.lt.u32.totalorder %s480_s30, %s640_s23 }
  0xff   : > { %p482_p7 = pnand %p481_p6, %p609_p4 }
 0x100   : > { %p487_p12 = por %p486_p11, %p485_p10 }
 0x101   : > { %p483_p9 = pneg %p482_p7 }
 0x102   : > { %p489_p0 = por %p488_p13, %p487_p12 }
 0x104   : > { %p490_p1 = pnand %p489_p0, %p483_p9 }
 0x106   : > { %493 = shalt.err (!%p490_p1)
}
 0x107   : > { %407 = dma.vmem_to_hbm [thread:$0]  (%p609_p4), %s642_s18, 256, %s640_s23, %s297_s26  }
 0x108 PF: > { %p413_p2 = scmp.ge.s32.totalorder %s544_s17, 2  ;;  %s325_s9 = sand.u32 1, %s524_s12  }
 0x109   : > { %s326_s10 = scalar_lea.sflag [#allocation3], %s325_s9 }
 0x10a   : > { %p410_p3 = pnand %p413_p2, %p616_p8 }
 0x10c   : > { %519 = dma.done.wait (!%p410_p3), %s326_s10, 256  }
 0x10d   : > { %521 = vsyncadd (!%p410_p3), %s326_s10, 4294967040  ;;  %s16_s17 = sadd.s32 1, %s544_s17   ;;  %s693_s12 = smov %s528_s13 }
 0x10e   : > { %p13_p5 = scmp.ge.s32.totalorder %s16_s17, 4   ;;  %s694_s13 = smov %s532_s14 }
 0x10f   : > { %s695_s14 = smov %s622_s25  ;;  %s696_s15 = smov %s540_s16 }
 0x110   : > { %s697_s16 = smov %s699_s20  ;;  %15 = sbr.rel (!%p13_p5) target bundleno = 4 (0x4), region = 67 }
 0x117   :  { %331 = vsyncpa [#allocation3], 1 }
 0x118   :  { %333 = vsyncpa [#allocation3 + $0x1], 1 }

</bundles_post_ra>
